<compile_context>
chip_gen: v7x
topology: tpu7x:2x2x1
jax: 0.10.0
libtpu: 0.0.40
codegen_flags: <defaults>
</compile_context>

<pallas_src>
import math

import jax
import jax.numpy as jnp
from jax.experimental import pallas as pl
from jax.experimental.pallas import tpu as pltpu

_SSP_SHIFT = math.log(2.0)

_MIN_GRID_STEPS = 8             # enough steps for v7x's 2 TCs + the pipeline
_MIN_BLOCK_BYTES = 128 * 1024   # ...but never fragment into tiny DMAs
_VMEM_LIMIT = 48 * 1024 * 1024  # safely below v7x's 64 MiB physical VMEM


def _ssp_kernel(x_ref, o_ref):
    # f32 transcendental path: required on v5e (no bf16 EUP) and safe everywhere.
    x = x_ref[...].astype(jnp.float32)
    y = jnp.maximum(x, 0.0) + jnp.log1p(jnp.exp(-jnp.abs(x))) - _SSP_SHIFT
    o_ref[...] = y.astype(o_ref.dtype)


def _round_up(v, m):
    return ((v + m - 1) // m) * m


def _as_lane_dense_2d(x):
    """Free (metadata-only) reshape of x to a lane-dense 2-D view."""
    total = x.size
    for wide in (4096, 2048, 1024, 512, 256, 128):
        if total % wide == 0:
            return x.reshape(total // wide, wide)
    if x.ndim >= 2:  # ragged total: keep the natural row-major view (still free)
        return x.reshape(-1, x.shape[-1])
    return x.reshape(1, total)


def _choose_blocks(M, N, itemsize, sub, block_rows, block_cols):
    bm = min(block_rows, _round_up(M, sub))
    bn = min(block_cols, _round_up(N, 128))

    def nsteps(m, n):
        return pl.cdiv(M, m) * pl.cdiv(N, n)

    # Shrink (rows first) until the grid has enough steps to feed the DMA
    # pipeline and both v7x TensorCores, but keep blocks >= _MIN_BLOCK_BYTES.
    while (nsteps(bm, bn) < _MIN_GRID_STEPS and bm > sub
           and bm * bn * itemsize >= 2 * _MIN_BLOCK_BYTES):
        bm = max(sub, _round_up(bm // 2, sub))
    while (nsteps(bm, bn) < _MIN_GRID_STEPS and bn > 128
           and bm * bn * itemsize >= 2 * _MIN_BLOCK_BYTES):
        bn = max(128, _round_up(bn // 2, 128))
    return bm, bn


def shifted_softplus(x, *, block_rows=512, block_cols=2048):
    """ShiftedSoftplus forward: softplus(x) - log(2); any shape, float dtype."""
    if x.size == 0:
        return x

    orig_shape = x.shape
    dtype = x.dtype
    itemsize = jnp.dtype(dtype).itemsize
    sub = max(8, 32 // itemsize)  # native sublane multiple: 8 f32 / 16 bf16 / 32 i8

    x2 = _as_lane_dense_2d(x)     # no copies, no padding
    M, N = x2.shape
    bm, bn = _choose_blocks(M, N, itemsize, sub, block_rows, block_cols)
    grid = (pl.cdiv(M, bm), pl.cdiv(N, bn))  # ragged edges handled by masking

    out = pl.pallas_call(
        _ssp_kernel,
        out_shape=jax.ShapeDtypeStruct((M, N), dtype),
        grid=grid,
        in_specs=[pl.BlockSpec((bm, bn), lambda i, j: (i, j))],
        out_specs=pl.BlockSpec((bm, bn), lambda i, j: (i, j)),
        compiler_params=pltpu.CompilerParams(
            dimension_semantics=("parallel", "parallel"),
            vmem_limit_bytes=_VMEM_LIMIT,
        ),
        cost_estimate=pl.CostEstimate(
            flops=5 * M * N,
            transcendentals=2 * M * N,
            bytes_accessed=2 * M * N * itemsize,
        ),
    )(x2)

    return out.reshape(orig_shape)


def _reference(x):
    return jax.nn.softplus(x.astype(jnp.float32)) - _SSP_SHIFT


if __name__ == "__main__":
    key = jax.random.PRNGKey(0)
    k1, k2, k3 = jax.random.split(key, 3)

    # Small shapes consistent with where ShiftedSoftplus sits in SchNet
    # ([atoms, hidden] / [edges, filters] activations):
    #  - (64, 128) f32: total divisible by 4096 -> wide lane-dense path.
    #  - (2, 16, 256) f32: 3-D input, wide path.
    #  - (10, 200) bf16: ragged fallback path, exercises masked edge blocks.
    x_a = 6.0 * jax.random.normal(k1, (64, 128), jnp.float32)
    x_b = 6.0 * jax.random.normal(k2, (2, 16, 256), jnp.float32)
    x_c = (6.0 * jax.random.normal(k3, (10, 200), jnp.float32)).astype(jnp.bfloat16)

    y_a = jax.block_until_ready(shifted_softplus(x_a))
    y_b = jax.block_until_ready(shifted_softplus(x_b))
    y_c = jax.block_until_ready(shifted_softplus(x_c))

    assert y_a.shape == x_a.shape and y_a.dtype == x_a.dtype
    assert y_b.shape == x_b.shape and y_b.dtype == x_b.dtype
    assert y_c.shape == x_c.shape and y_c.dtype == x_c.dtype

    assert jnp.allclose(y_a, _reference(x_a), rtol=1e-5, atol=1e-5), "f32 2D mismatch"
    assert jnp.allclose(y_b, _reference(x_b), rtol=1e-5, atol=1e-5), "f32 3D mismatch"
    assert jnp.allclose(y_c.astype(jnp.float32), _reference(x_c),
                        rtol=2e-2, atol=2e-2), "bf16 ragged mismatch"

    print("KERNEL_OK")
</pallas_src>

<mosaic_0001>
module attributes {stable_mosaic.version = 11 : i64} {
  func.func @_ssp_kernel(%arg0: i32, %arg1: i32, %arg2: memref<8x2048xf32, #tpu.memory_space<vmem>>, %arg3: memref<8x2048xf32, #tpu.memory_space<vmem>>) attributes {dimension_semantics = [#tpu.dimension_semantics<parallel>, #tpu.dimension_semantics<parallel>], iteration_bounds = array<i64: 1, 2>, scalar_prefetch = 0 : i64, scratch_operands = 0 : i64, tpu.core_type = #tpu.core_type<tc>, window_params = [{transform_indices = @transform_0, window_bounds = array<i64: 8, 2048>}, {transform_indices = @transform_1, window_bounds = array<i64: 8, 2048>}]} {
    %c0 = arith.constant 0 : index
    %c0_0 = arith.constant 0 : index
    %0 = vector.load %arg2[%c0, %c0_0] : memref<8x2048xf32, #tpu.memory_space<vmem>>, vector<8x2048xf32>
    %cst = arith.constant 0.000000e+00 : f32
    %1 = vector.broadcast %cst : f32 to vector<8x2048xf32>
    %2 = arith.maximumf %0, %1 : vector<8x2048xf32>
    %3 = math.absf %0 : vector<8x2048xf32>
    %cst_1 = arith.constant 0.000000e+00 : f32
    %4 = vector.broadcast %cst_1 : f32 to vector<8x2048xf32>
    %5 = arith.subf %4, %3 : vector<8x2048xf32>
    %6 = math.exp %5 : vector<8x2048xf32>
    %7 = math.log1p %6 : vector<8x2048xf32>
    %8 = arith.addf %2, %7 : vector<8x2048xf32>
    %cst_2 = arith.constant 0.693147182 : f32
    %9 = vector.broadcast %cst_2 : f32 to vector<8x2048xf32>
    %10 = arith.subf %8, %9 : vector<8x2048xf32>
    %c0_3 = arith.constant 0 : index
    %c0_4 = arith.constant 0 : index
    %11 = vector.load %arg3[%c0_3, %c0_4] : memref<8x2048xf32, #tpu.memory_space<vmem>>, vector<8x2048xf32>
    tpu.vector_store %arg3[%c0_3, %c0_4], %10 {strides = array<i32>} : memref<8x2048xf32, #tpu.memory_space<vmem>>, vector<8x2048xf32>,
    return
  }
  func.func @transform_0(%arg0: i32, %arg1: i32) -> (i32, i32) {
    %c0_i32 = arith.constant 0 : i32
    return %arg0, %arg1 : i32, i32
  }
  func.func @transform_1(%arg0: i32, %arg1: i32) -> (i32, i32) {
    %c0_i32 = arith.constant 0 : i32
    return %arg0, %arg1 : i32, i32
  }
}

</mosaic_0001>

<bundles_post_ra>
// kernel: tpu_custom_call.1
= control target key start
LH: loop header
LB: loop body
LE: loop exit
PB: predicated region body
PF: predicated region fallthrough
CT: control target
= control target key end

     0   :  { %6 = vsyncpa [#allocation3], 0  ;;  %s1217_s0 = inlined_call_operand.hbm [shape: f32[2,4096], index: 0, kind: input, shape index: {}]   ;;  %s1218_s1 = inlined_call_operand.hbm [shape: f32[2,4096], index: 1, kind: output, shape index: {}]  }
   0x1   :  { %8 = vsyncpa [#allocation3 + $0x1], 0 }
   0x2   :  { %9 = vsyncpa [#allocation4], 0 }
   0x3   :  { %11 = vsyncpa [#allocation4 + $0x1], 0  ;;  %s846_s6 = smov 0   ;;  %s848_s7 = smov 0  }
   0x4   :  { %s850_s8 = smov 0   ;;  %s852_s9 = smov 0  }
   0x5   :  { %s854_s10 = smov 0   ;;  %s856_s11 = smov 0  }
   0x6 LB: > { %s566_s12 = sadd.s32 4294967295, %s826_s11   ;;  %s567_s13 = sadd.s32 4294967294, %s826_s11   ;;  %s826_s11 = sphi %s856_s11, %s17_s11   ;;  %s822_s10 = sphi %s854_s10, %s1251_s10   ;;  %s818_s9 = sphi %s852_s9, %s1250_s9   ;;  %s814_s8 = sphi %s850_s8, %s1249_s8   ;;  %s810_s7 = sphi %s848_s7, %s1248_s7   ;;  %s806_s6 = sphi %s846_s6, %s1247_s6  }
   0x7   : > { %s26_s14 = sadd.s32 1, %s822_s10  ;;  %s38_s15 = sadd.s32 1, %s814_s8 }
   0x8   : > { %p27_p0 = scmp.ge.s32.totalorder %s26_s14, 2  ;;  %p45_p1 = scmp.ne.s32.totalorder %s814_s8, %s810_s7 }
   0x9   : > { %p46_p2 = scmp.eq.s32.totalorder %s826_s11, 0  ;;  %p51_p3 = scmp.ne.s32.totalorder %s810_s7, %s806_s6 }
   0xa   : > { %s1253_s14 = smov (%p27_p0, %s26_s14), 0  ;;  %p52_p5 = scmp.eq.s32.totalorder %s566_s12, 0 }
   0xb   : > { %p47_p4 = por %p46_p2, %p45_p1  ;;  %s34_s16 = ssub.s32 %s822_s10, %s1253_s14 }
   0xc   : > { %p77_p6 = scmp.eq.s32.totalorder %s566_s12, 1  ;;  %p36_p7 = scmp.eq.s32.totalorder %s34_s16, 0 }
   0xd   : > { %p889_p8 = por %p52_p5, %p51_p3  ;;  %p83_p10 = scmp.eq.s32.totalorder %s567_s13, 1 }
   0xe   : > { %p893_p9 = por %p77_p6, %p45_p1  ;;  %p1219_p12 = scmp.ge.s32.totalorder %s826_s11, 2 }
   0xf   : > { %s898_s19 = scalar_select %p36_p7, %s814_s8, %s38_s15  }
  0x10   : > { %p900_p11 = por %p83_p10, %p51_p3  ;;  %99 = sbr.rel (%p1219_p12) target bundleno = 55 (0x37), region = 16 }
  0x12   : > { %s1222_s20 = scalar_select %p900_p11, 1, 0 }
  0x17   : > { %102 = sbr.rel (!%p47_p4) target bundleno = 55 (0x37), region = 20  ;;  %s103_s21 = sand.u32 (%p47_p4), 1, %s814_s8  }
  0x18   : > { %s570_s22 = sshll.u32 (%p47_p4), %s103_s21, 7  ;;  %s908_s23 = scalar_lea.sflag (%p47_p4), [#allocation3], %s103_s21 }
  0x19   : > { %s107_s24 = scalar_lea.vmem (%p47_p4), [#allocation2], %s570_s22 }
  0x1e   : > { %115 = vsyncadd %s908_s23, 1536  ;;  %s597_s25 = sshll.u32 %s822_s10, 9  ;;  %s122_s26 = sshll.u32 %s107_s24, 4  ;;  %s917_s26 = int_to_ptr.vmem [resolvable:$true] %s122_s26 }
  0x1f   : > { %s915_s29 = scalar_lea.hbm %s1217_s0, %s597_s25  ;;  %s726_s4 = scalar_lea.hbm %s1217_s0, 1024 }
  0x20   : > { %s724_s30 = scalar_lea.hbm %s915_s29, 512  ;;  %p727_p0 = scmp.lt.u32.totalorder %s915_s29, %s1217_s0 }
  0x21   : > { %p725_p13 = scmp.ne.s32.totalorder %s915_s29, %s724_s30  ;;  %p728_p1 = scmp.lt.u32.totalorder %s726_s4, %s724_s30 }
  0x22   : > { %p730_p3 = scmp.lt.u32.totalorder %s724_s30, %s915_s29 }
  0x23   : > { %p729_p2 = por %p728_p1, %p727_p0 }
  0x25   : > { %p731_p4 = por %p730_p3, %p729_p2 }
  0x27   : > { %p732_p5 = pnand %p731_p4, %p725_p13 }
  0x29   : > { %735 = shalt.err (!%p732_p5)
}
  0x2a   : > { %s736_s13 = scalar_lea.vmem %s917_s26, 512  ;;  %s828_s15 = smov [#allocation2]  }
  0x2b   : > { %p737_p6 = scmp.ne.s32.totalorder %s917_s26, %s736_s13  ;;  %s738_s16 = sshll.u32 %s828_s15, 4  ;;  %s739_s16 = int_to_ptr.vmem [resolvable:$false] %s738_s16 }
  0x2c   : > { %s740_s21 = scalar_lea.vmem %s739_s16, 4096  ;;  %p741_p7 = scmp.lt.s32.totalorder %s917_s26, %s739_s16 }
  0x2d   : > { %p742_p10 = scmp.lt.s32.totalorder %s740_s21, %s736_s13 }
  0x2f   : > { %p743_p12 = por %p742_p10, %p741_p7 }
  0x31   : > { %p744_p11 = pnand %p743_p12, %p737_p6 }
  0x33   : > { %747 = shalt.err (!%p744_p11)
}
  0x34   : > { %s829_s22 = smov 1024   ;;  %s830_s24 = smov 512  }
  0x35   : > { %s831_s25 = smov 32  }
  0x36   : > { %128 = dma.hbm_to_vmem [thread:$0]  %s915_s29, 512, %s917_s26, %s908_s23, %s829_s22, %s830_s24, %s831_s25  }
  0x37 PF: > { %p573_p13 = scmp.ge.s32.totalorder %s826_s11, 1  ;;  %p130_p0 = scmp.lt.s32.totalorder %s826_s11, 3 }
  0x39   : > { %p131_p1 = pnand %p573_p13, %p130_p0 }
  0x3a   : > { %s938_s27 = sand.u32 (!%p131_p1), 1, %s810_s7  }
  0x3b   : > { %134 = sbr.rel (%p131_p1) target bundleno = 181 (0xb5), region = 24  ;;  %s574_s28 = sshll.u32 (!%p131_p1), %s938_s27, 7 }
  0x3c   : > { %s137_s30 = scalar_lea.sflag (!%p131_p1), [#allocation3], %s938_s27  ;;  %s944_s2 = scalar_lea.vmem (!%p131_p1), [#allocation2], %s574_s28 }
  0x42   : > { %797 = dma.done.wait (%p889_p8), %s137_s30, 2048  }
  0x43   : > { %799 = vsyncadd (%p889_p8), %s137_s30, 4294965248  ;;  %v951_v0 = vld [vmem:[%s944_s2] sm:$0xff]  ;;  %v954_v1 = vld [vmem:[%s944_s2 + $0x8] sm:$0xff]  ;;  %s1076_s17 = scalar_lea.vmem [#allocation5], %s574_s28  ;;  %s458_s23 = scalar_lea.sflag [#allocation4], %s938_s27 }
  0x44   : > { %v957_v2 = vld [vmem:[%s944_s2 + $0x10] sm:$0xff]  ;;  %v201_v3 = vand.u32 2147483647, %v951_v0  ;;  %v202_v4 = vand.u32 2147483647, %v954_v1  ;;  %v963_v6 = vld [vmem:[%s944_s2 + $0x18] sm:$0xff] }
  0x45   : > { %v203_v5 = vand.u32 2147483647, %v957_v2  ;;  %v966_v7 = vld [vmem:[%s944_s2 + $0x20] sm:$0xff]  ;;  %v204_v10 = vand.u32 2147483647, %v963_v6  ;;  %v970_v11 = vld [vmem:[%s944_s2 + $0x28] sm:$0xff] }
  0x46   : > { %v217_v8 = vsub.f32 0.0, %v201_v3  ;;  %v218_v9 = vsub.f32 0.0, %v202_v4  ;;  %v205_v13 = vand.u32 2147483647, %v966_v7  ;;  %v974_v14 = vld [vmem:[%s944_s2 + $0x30] sm:$0xff]  ;;  %v977_v15 = vld [vmem:[%s944_s2 + $0x38] sm:$0xff] }
  0x47   : > { %v219_v12 = vsub.f32 0.0, %v203_v5  ;;  %v220_v18 = vsub.f32 0.0, %v204_v10  ;;  %v206_v21 = vand.u32 2147483647, %v970_v11  ;;  %v207_v23 = vand.u32 2147483647, %v974_v14 }
  0x48   : > { %v233_v16 = vmul.f32 1.442695, %v217_v8  ;;  %v235_v17 = vmul.f32 1.442695, %v218_v9  ;;  %v221_v20 = vsub.f32 0.0, %v205_v13  ;;  %v983_v27 = vld [vmem:[%s944_s2 + $0x40] sm:$0xff] }
  0x49   : > { %v237_v19 = vmul.f32 1.442695, %v219_v12  ;;  %v239_v22 = vmul.f32 1.442695, %v220_v18  ;;  %v208_v24 = vand.u32 2147483647, %v977_v15 }
  0x4a   : > { %660 = vpow2.f32 %v233_v16  ;;  %v241_v25 = vmul.f32 1.442695, %v221_v20  ;;  %v222_v26 = vsub.f32 0.0, %v206_v21  ;;  %v986_v28 = vld [vmem:[%s944_s2 + $0x48] sm:$0xff]  ;;  %v223_v29 = vsub.f32 0.0, %v207_v23  ;;  %v989_v31 = vld [vmem:[%s944_s2 + $0x50] sm:$0xff] }
  0x4b   : > { %662 = vpow2.f32 %v235_v17  ;;  %v224_v30 = vsub.f32 0.0, %v208_v24  ;;  %v209_v33 = vand.u32 2147483647, %v983_v27  ;;  %v993_v34 = vld [vmem:[%s944_s2 + $0x58] sm:$0xff]  ;;  %v210_v37 = vand.u32 2147483647, %v986_v28 }
  0x4c   : > { %664 = vpow2.f32 %v237_v19  ;;  %v243_v32 = vmul.f32 1.442695, %v222_v26  ;;  %v245_v35 = vmul.f32 1.442695, %v223_v29  ;;  %v185_v38 = vmax.f32 %v951_v0, 0.0  ;;  %v1003_v48 = vld [vmem:[%s944_s2 + $0x60] sm:$0xff] }
  0x4d   : > { %666 = vpow2.f32 %v239_v22  ;;  %v247_v36 = vmul.f32 1.442695, %v224_v30  ;;  %v186_v39 = vmax.f32 %v954_v1, 0.0  ;;  %v225_v40 = vsub.f32 0.0, %v209_v33  ;;  %v1011_v59 = vld [vmem:[%s944_s2 + $0x68] sm:$0xff] }
  0x4e   : > { %668 = vpow2.f32 %v241_v25  ;;  %v211_v41 = vand.u32 2147483647, %v989_v31  ;;  %v187_v42 = vmax.f32 %v957_v2, 0.0  ;;  %v226_v43 = vsub.f32 0.0, %v210_v37 }
  0x4f   : > { %670 = vpow2.f32 %v243_v32  ;;  %v212_v44 = vand.u32 2147483647, %v993_v34  ;;  %v188_v45 = vmax.f32 %v963_v6, 0.0  ;;  %v249_v46 = vmul.f32 1.442695, %v225_v40 }
  0x50   : > { %672 = vpow2.f32 %v245_v35  ;;  %v227_v47 = vsub.f32 0.0, %v211_v41  ;;  %v189_v49 = vmax.f32 %v966_v7, 0.0  ;;  %v251_v50 = vmul.f32 1.442695, %v226_v43 }
  0x51   : > { %674 = vpow2.f32 %v247_v36  ;;  %v228_v51 = vsub.f32 0.0, %v212_v44  ;;  %v190_v52 = vmax.f32 %v970_v11, 0.0  ;;  %v191_v53 = vmax.f32 %v974_v14, 0.0 }
  0x52   : > { %676 = vpow2.f32 %v249_v46  ;;  %v253_v54 = vmul.f32 1.442695, %v227_v47  ;;  %v192_v56 = vmax.f32 %v977_v15, 0.0  ;;  %v213_v58 = vand.u32 2147483647, %v1003_v48 }
  0x53   : > { %678 = vpow2.f32 %v251_v50  ;;  %v255_v57 = vmul.f32 1.442695, %v228_v51  ;;  %v193_v8 = vmax.f32 %v983_v27, 0.0  ;;  %v214_v13 = vand.u32 2147483647, %v1011_v59 }
  0x54   : > { %v661_v55 = vpop.eup %660  ;;  %680 = vpow2.f32 %v253_v54  ;;  %v1019_v22 = vsub.f32 0.0, %v213_v58 }
  0x55   : > { %v663_v60 = vpop.eup %662  ;;  %v265_v61 = vadd.f32 1.0, %v661_v55  ;;  %v268_v62 = vmul.f32 -0.5, %v661_v55  ;;  %v271_v63 = vand.u32 2147483647, %v661_v55  ;;  %682 = vpow2.f32 %v255_v57 }
  0x56   : > { %v665_v3 = vpop.eup %664  ;;  %v274_v4 = vadd.f32 1.0, %v663_v60  ;;  %v277_v5 = vmul.f32 -0.5, %v663_v60  ;;  %v280_v10 = vand.u32 2147483647, %v663_v60  ;;  %v257_v15 = vmul.f32 1.442695, %v1019_v22 }
  0x57   : > { %v667_v9 = vpop.eup %666  ;;  %684 = vlog2.f32 %v265_v61  ;;  %v283_v12 = vadd.f32 1.0, %v665_v3  ;;  %v269_v17 = vadd.f32 1.0, %v268_v62  ;;  %v286_v19 = vmul.f32 -0.5, %v665_v3 }
  0x58   : > { %v669_v16 = vpop.eup %668  ;;  %686 = vlog2.f32 %v274_v4  ;;  %v278_v18 = vadd.f32 1.0, %v277_v5  ;;  %vm1015_vm0 = vcmp.lt.f32.partialorder %v271_v63, 0.0004427343  ;;  %v292_v21 = vadd.f32 1.0, %v667_v9 }
  0x59   : > { %688 = vlog2.f32 %v283_v12  ;;  %v671_v23 = vpop.eup %670  ;;  %v287_v24 = vadd.f32 1.0, %v286_v19  ;;  %v289_v25 = vand.u32 2147483647, %v665_v3  ;;  %v295_v26 = vmul.f32 -0.5, %v667_v9 }
  0x5a   : > { %v298_v29 = vand.u32 2147483647, %v667_v9  ;;  %v673_v30 = vpop.eup %672  ;;  %vm1021_vm1 = vcmp.lt.f32.partialorder %v280_v10, 0.0004427343  ;;  %690 = vlog2.f32 %v292_v21  ;;  %v301_v33 = vadd.f32 1.0, %v669_v16 }
  0x5b   : > { %v304_v35 = vmul.f32 -0.5, %v669_v16  ;;  %v675_v36 = vpop.eup %674  ;;  %v270_v37 = vmul.f32 %v661_v55, %v269_v17  ;;  %v279_v40 = vmul.f32 %v663_v60, %v278_v18  ;;  %v296_v41 = vadd.f32 1.0, %v295_v26 }
  0x5c   : > { %v307_v43 = vand.u32 2147483647, %v669_v16  ;;  %v1025_v44 = vpop.eup %676  ;;  %692 = vlog2.f32 %v301_v33  ;;  %v310_v47 = vadd.f32 1.0, %v671_v23  ;;  %v313_v50 = vmul.f32 -0.5, %v671_v23 }
  0x5d   : > { %v305_v46 = vadd.f32 1.0, %v304_v35  ;;  %v1027_v51 = vpop.eup %678  ;;  %v288_v54 = vmul.f32 %v665_v3, %v287_v24  ;;  %vm1029_vm2 = vcmp.lt.f32.partialorder %v289_v25, 0.0004427343  ;;  %vm1033_vm3 = vcmp.lt.f32.partialorder %v298_v29, 0.0004427343 }
  0x5e   : > { %v319_v55 = vadd.f32 1.0, %v673_v30  ;;  %v1037_v60 = vpop.eup %680  ;;  %694 = vlog2.f32 %v310_v47  ;;  %v314_v61 = vadd.f32 1.0, %v313_v50  ;;  %v316_v62 = vand.u32 2147483647, %v671_v23 }
  0x5f   : > { %v322_v63 = vmul.f32 -0.5, %v673_v30  ;;  %v1039_v4 = vpop.eup %682  ;;  %v297_v5 = vmul.f32 %v667_v9, %v296_v41  ;;  %vm1041_vm4 = vcmp.lt.f32.partialorder %v307_v43, 0.0004427343  ;;  %v328_v10 = vadd.f32 1.0, %v675_v36 }
  0x60   : > { %696 = vlog2.f32 %v319_v55  ;;  %v306_v17 = vmul.f32 %v669_v16, %v305_v46  ;;  %v325_v19 = vand.u32 2147483647, %v673_v30  ;;  %v331_v21 = vmul.f32 -0.5, %v675_v36 }
  0x61   : > { %v685_v12 = vpop.eup %684  ;;  %v323_v18 = vadd.f32 1.0, %v322_v63  ;;  %698 = vlog2.f32 %v328_v10  ;;  %v334_v26 = vand.u32 2147483647, %v675_v36  ;;  %v337_v29 = vadd.f32 1.0, %v1025_v44 }
  0x62   : > { %v687_v24 = vpop.eup %686  ;;  %v267_v25 = vmul.f32 0.6931472, %v685_v12  ;;  %v315_v9 = vmul.f32 %v671_v23, %v314_v61  ;;  %vm1046_vm5 = vcmp.lt.f32.partialorder %v316_v62, 0.0004427343  ;;  %v332_v43 = vadd.f32 1.0, %v331_v21 }
  0x63   : > { %v689_v33 = vpop.eup %688  ;;  %v276_v35 = vmul.f32 0.6931472, %v687_v24  ;;  %700 = vlog2.f32 %v337_v29  ;;  %v340_v47 = vmul.f32 -0.5, %v1025_v44  ;;  %v324_v23 = vmul.f32 %v673_v30, %v323_v18 }
  0x64   : > { %v273_v16 = vsel %vm1015_vm0, %v270_v37, %v267_v25  ;;  %v285_v46 = vmul.f32 0.6931472, %v689_v33  ;;  %v691_v50 = vpop.eup %690  ;;  %vm1057_vm6 = vcmp.lt.f32.partialorder %v325_v19, 0.0004427343  ;;  %vm1065_vm7 = vcmp.lt.f32.partialorder %v334_v26, 0.0004427343 }
  0x65   : > { %v409_v55 = vadd.f32 %v273_v16, %v185_v38  ;;  %v282_v63 = vsel %vm1021_vm1, %v279_v40, %v276_v35  ;;  %v294_v62 = vmul.f32 0.6931472, %v691_v50  ;;  %v341_v32 = vadd.f32 1.0, %v340_v47  ;;  %v1092_v26 = vld [vmem:[%s944_s2 + $0x70] sm:$0xff] }
  0x66   : > { %v410_v20 = vadd.f32 %v282_v63, %v186_v39  ;;  %v291_v37 = vsel %vm1029_vm2, %v288_v54, %v285_v46  ;;  %v693_v0 = vpop.eup %692  ;;  %v346_v40 = vadd.f32 1.0, %v1027_v51  ;;  %v333_v57 = vmul.f32 %v675_v36, %v332_v43 }
  0x67   : > { %v576_v38 = vadd.f32 -0.6931472, %v409_v55  ;;  %v411_v30 = vadd.f32 %v291_v37, %v187_v42  ;;  %v300_v1 = vsel %vm1033_vm3, %v297_v5, %v294_v62  ;;  %v303_v39 = vmul.f32 0.6931472, %v693_v0 }
  0x68   : > { %v577_v12 = vadd.f32 -0.6931472, %v410_v20  ;;  %v695_v54 = vpop.eup %694  ;;  %v412_v42 = vadd.f32 %v300_v1, %v188_v45  ;;  %702 = vlog2.f32 %v346_v40  ;;  %v349_v18 = vmul.f32 -0.5, %v1027_v51 }
  0x69   : > { %441 = vst [vmem:[%s1076_s17] sm:$0xff] %v576_v38  ;;  %v578_v2 = vadd.f32 -0.6931472, %v411_v30  ;;  %v309_v36 = vsel %vm1041_vm4, %v306_v17, %v303_v39  ;;  %v312_v5 = vmul.f32 0.6931472, %v695_v54  ;;  %v343_v19 = vand.u32 2147483647, %v1025_v44 }
  0x6a   : > { %v697_v58 = vpop.eup %696  ;;  %442 = vst [vmem:[%s1076_s17 + $0x8] sm:$0xff] %v577_v12  ;;  %v355_v21 = vadd.f32 1.0, %v1037_v60  ;;  %v579_v24 = vadd.f32 -0.6931472, %v412_v42  ;;  %v413_v6 = vadd.f32 %v309_v36, %v189_v49  ;;  %v342_v25 = vmul.f32 %v1025_v44, %v341_v32 }
  0x6b   : > { %443 = vst [vmem:[%s1076_s17 + $0x10] sm:$0xff] %v578_v2  ;;  %v321_v45 = vmul.f32 0.6931472, %v697_v58  ;;  %v699_v29 = vpop.eup %698  ;;  %v318_v3 = vsel %vm1046_vm5, %v315_v9, %v312_v5  ;;  %v350_v17 = vadd.f32 1.0, %v349_v18  ;;  %v358_v33 = vmul.f32 -0.5, %v1037_v60 }
  0x6c   : > { %704 = vlog2.f32 %v355_v21  ;;  %444 = vst [vmem:[%s1076_s17 + $0x18] sm:$0xff] %v579_v24  ;;  %v580_v35 = vadd.f32 -0.6931472, %v413_v6  ;;  %v414_v7 = vadd.f32 %v318_v3, %v190_v52  ;;  %v330_v44 = vmul.f32 0.6931472, %v699_v29 }
  0x6d   : > { %v327_v49 = vsel %vm1057_vm6, %v324_v23, %v321_v45  ;;  %v701_v43 = vpop.eup %700  ;;  %vm1104_vm8 = vcmp.lt.f32.partialorder %v343_v19, 0.0004427343  ;;  %v352_v41 = vand.u32 2147483647, %v1027_v51  ;;  %v215_v46 = vand.u32 2147483647, %v1092_v26 }
  0x6e   : > { %v415_v16 = vadd.f32 %v327_v49, %v191_v53  ;;  %445 = vst [vmem:[%s1076_s17 + $0x20] sm:$0xff] %v580_v35  ;;  %v581_v11 = vadd.f32 -0.6931472, %v414_v7  ;;  %v336_v52 = vsel %vm1065_vm7, %v333_v57, %v330_v44  ;;  %v339_v47 = vmul.f32 0.6931472, %v701_v43 }
  0x6f   : > { %v364_v50 = vadd.f32 1.0, %v1039_v4  ;;  %v416_v53 = vadd.f32 %v336_v52, %v192_v56  ;;  %v351_v55 = vmul.f32 %v1027_v51, %v350_v17  ;;  %v359_v63 = vadd.f32 1.0, %v358_v33  ;;  %v1129_v51 = vld [vmem:[%s944_s2 + $0x78] sm:$0xff] }
  0x70   : > { %v582_v14 = vadd.f32 -0.6931472, %v415_v16  ;;  %446 = vst [vmem:[%s1076_s17 + $0x28] sm:$0xff] %v581_v11  ;;  %v345_v23 = vsel %vm1104_vm8, %v342_v25, %v339_v47  ;;  %v361_v61 = vand.u32 2147483647, %v1037_v60  ;;  %v367_v20 = vmul.f32 -0.5, %v1039_v4 }
  0x71   : > { %706 = vlog2.f32 %v364_v50  ;;  %v583_v37 = vadd.f32 -0.6931472, %v416_v53  ;;  %v417_v62 = vadd.f32 %v345_v23, %v193_v8  ;;  %v230_v56 = vsub.f32 0.0, %v214_v13 }
  0x72   : > { %447 = vst [vmem:[%s1076_s17 + $0x30] sm:$0xff] %v582_v14  ;;  %v703_v10 = vpop.eup %702  ;;  %v194_v0 = vmax.f32 %v986_v28, 0.0  ;;  %vm1132_vm9 = vcmp.lt.f32.partialorder %v352_v41, 0.0004427343  ;;  %v195_v30 = vmax.f32 %v989_v31, 0.0  ;;  %v231_v32 = vsub.f32 0.0, %v215_v46 }
  0x73   : > { %448 = vst [vmem:[%s1076_s17 + $0x38] sm:$0xff] %v583_v37  ;;  %v584_v27 = vadd.f32 -0.6931472, %v417_v62  ;;  %v348_v8 = vmul.f32 0.6931472, %v703_v10  ;;  %708 = vpow2.f32 %v257_v15  ;;  %v360_v13 = vmul.f32 %v1037_v60, %v359_v63 }
  0x74   : > { %v259_v22 = vmul.f32 1.442695, %v230_v56  ;;  %vm1139_vm10 = vcmp.lt.f32.partialorder %v361_v61, 0.0004427343  ;;  %v261_v12 = vmul.f32 1.442695, %v231_v32 }
  0x75   : > { %v216_v28 = vand.u32 2147483647, %v1129_v51  ;;  %449 = vst [vmem:[%s1076_s17 + $0x40] sm:$0xff] %v584_v27  ;;  %v354_v31 = vsel %vm1132_vm9, %v351_v55, %v348_v8  ;;  %v368_v39 = vadd.f32 1.0, %v367_v20  ;;  %v370_v57 = vand.u32 2147483647, %v1039_v4 }
  0x76   : > { %v705_v1 = vpop.eup %704  ;;  %710 = vpow2.f32 %v259_v22  ;;  %v418_v54 = vadd.f32 %v354_v31, %v194_v0  ;;  %v196_v21 = vmax.f32 %v993_v34, 0.0  ;;  %v197_v53 = vmax.f32 %v1003_v48, 0.0 }
  0x77   : > { %v357_v2 = vmul.f32 0.6931472, %v705_v1  ;;  %712 = vpow2.f32 %v261_v12  ;;  %v232_v60 = vsub.f32 0.0, %v216_v28  ;;  %v369_v5 = vmul.f32 %v1039_v4, %v368_v39 }
  0x78   : > { %v585_v42 = vadd.f32 -0.6931472, %v418_v54  ;;  %vm371_vm11 = vcmp.lt.f32.partialorder %v370_v57, 0.0004427343  ;;  %v198_v23 = vmax.f32 %v1011_v59, 0.0  ;;  %v200_v40 = vmax.f32 %v1129_v51, 0.0 }
  0x79   : > { %v363_v18 = vsel %vm1139_vm10, %v360_v13, %v357_v2  ;;  %v263_v58 = vmul.f32 1.442695, %v232_v60 }
  0x7a   : > { %v419_v36 = vadd.f32 %v363_v18, %v195_v30  ;;  %450 = vst [vmem:[%s1076_s17 + $0x48] sm:$0xff] %v585_v42  ;;  %v199_v30 = vmax.f32 %v1092_v26, 0.0 }
  0x7b   : > { %v707_v19 = vpop.eup %706  ;;  %714 = vpow2.f32 %v263_v58 }
  0x7c   : > { %v586_v24 = vadd.f32 -0.6931472, %v419_v36  ;;  %v366_v6 = vmul.f32 0.6931472, %v707_v19 }
  0x7d   : > { %v709_v45 = vpop.eup %708 }
  0x7e   : > { %451 = vst [vmem:[%s1076_s17 + $0x50] sm:$0xff] %v586_v24  ;;  %v372_v25 = vsel %vm371_vm11, %v369_v5, %v366_v6  ;;  %v373_v3 = vadd.f32 1.0, %v709_v45  ;;  %v376_v7 = vmul.f32 -0.5, %v709_v45  ;;  %v379_v41 = vand.u32 2147483647, %v709_v45 }
  0x7f   : > { %v420_v29 = vadd.f32 %v372_v25, %v196_v21 }
  0x80   : > { %v711_v17 = vpop.eup %710  ;;  %716 = vlog2.f32 %v373_v3  ;;  %v377_v43 = vadd.f32 1.0, %v376_v7  ;;  %vm380_vm12 = vcmp.lt.f32.partialorder %v379_v41, 0.0004427343 }
  0x81   : > { %v713_v33 = vpop.eup %712  ;;  %v587_v35 = vadd.f32 -0.6931472, %v420_v29  ;;  %v382_v4 = vadd.f32 1.0, %v711_v17  ;;  %v385_v44 = vmul.f32 -0.5, %v711_v17  ;;  %v388_v47 = vand.u32 2147483647, %v711_v17 }
  0x82   : > { %v391_v49 = vadd.f32 1.0, %v713_v33  ;;  %v394_v16 = vmul.f32 -0.5, %v713_v33  ;;  %v378_v52 = vmul.f32 %v709_v45, %v377_v43  ;;  %v397_v55 = vand.u32 2147483647, %v713_v33 }
  0x83   : > { %452 = vst [vmem:[%s1076_s17 + $0x58] sm:$0xff] %v587_v35  ;;  %718 = vlog2.f32 %v382_v4  ;;  %v386_v46 = vadd.f32 1.0, %v385_v44  ;;  %vm389_vm13 = vcmp.lt.f32.partialorder %v388_v47, 0.0004427343 }
  0x84   : > { %720 = vlog2.f32 %v391_v49  ;;  %v395_v50 = vadd.f32 1.0, %v394_v16  ;;  %vm398_vm14 = vcmp.lt.f32.partialorder %v397_v55, 0.0004427343 }
  0x85   : > { %v715_v34 = vpop.eup %714  ;;  %v387_v61 = vmul.f32 %v711_v17, %v386_v46 }
  0x86   : > { %v400_v9 = vadd.f32 1.0, %v715_v34  ;;  %v403_v11 = vmul.f32 -0.5, %v715_v34  ;;  %v396_v15 = vmul.f32 %v713_v33, %v395_v50  ;;  %v406_v56 = vand.u32 2147483647, %v715_v34 }
  0x88   : > { %722 = vlog2.f32 %v400_v9  ;;  %v404_v20 = vadd.f32 1.0, %v403_v11  ;;  %vm407_vm15 = vcmp.lt.f32.partialorder %v406_v56, 0.0004427343 }
  0x8a   : > { %v717_v14 = vpop.eup %716  ;;  %v405_v59 = vmul.f32 %v715_v34, %v404_v20 }
  0x8b   : > { %v375_v63 = vmul.f32 0.6931472, %v717_v14 }
  0x8d   : > { %v719_v37 = vpop.eup %718  ;;  %v381_v62 = vsel %vm380_vm12, %v378_v52, %v375_v63 }
  0x8e   : > { %v721_v10 = vpop.eup %720  ;;  %v421_v0 = vadd.f32 %v381_v62, %v197_v53  ;;  %v384_v38 = vmul.f32 0.6931472, %v719_v37 }
  0x8f   : > { %v393_v48 = vmul.f32 0.6931472, %v721_v10 }
  0x90   : > { %v588_v32 = vadd.f32 -0.6931472, %v421_v0  ;;  %v390_v27 = vsel %vm389_vm13, %v387_v61, %v384_v38 }
  0x91   : > { %v422_v22 = vadd.f32 %v390_v27, %v198_v23  ;;  %v399_v13 = vsel %vm398_vm14, %v396_v15, %v393_v48 }
  0x92   : > { %v723_v8 = vpop.eup %722  ;;  %453 = vst [vmem:[%s1076_s17 + $0x60] sm:$0xff] %v588_v32  ;;  %v423_v12 = vadd.f32 %v399_v13, %v199_v30 }
  0x93   : > { %v402_v28 = vmul.f32 0.6931472, %v723_v8  ;;  %v589_v1 = vadd.f32 -0.6931472, %v422_v22 }
  0x94   : > { %v590_v26 = vadd.f32 -0.6931472, %v423_v12  ;;  %464 = sbr.rel (!%p893_p9) target bundleno = 181 (0xb5), region = 32 }
  0x95   : > { %v408_v31 = vsel %vm407_vm15, %v405_v59, %v402_v28  ;;  %454 = vst [vmem:[%s1076_s17 + $0x68] sm:$0xff] %v589_v1 }
  0x96   : > { %v424_v39 = vadd.f32 %v408_v31, %v200_v40  ;;  %455 = vst [vmem:[%s1076_s17 + $0x70] sm:$0xff] %v590_v26 }
  0x98   : > { %v591_v57 = vadd.f32 -0.6931472, %v424_v39 }
  0x9a   : > { %456 = vst [vmem:[%s1076_s17 + $0x78] sm:$0xff] %v591_v57 }
  0x9b   : > { %472 = vsyncadd %s458_s23, 1536  ;;  %s598_s26 = sshll.u32 %s818_s9, 9  ;;  %s479_s29 = sshll.u32 %s1076_s17, 4  ;;  %s1175_s29 = int_to_ptr.vmem [resolvable:$true] %s479_s29 }
  0x9c   : > { %s1173_s5 = scalar_lea.hbm %s1218_s1, %s598_s26  ;;  %s748_s12 = scalar_lea.vmem %s1175_s29, 512 }
  0x9d   : > { %p749_p8 = scmp.ne.s32.totalorder %s1175_s29, %s748_s12  ;;  %s832_s18 = smov [#allocation5]  }
  0x9e   : > { %s750_s13 = sshll.u32 %s832_s18, 4  ;;  %s751_s13 = int_to_ptr.vmem [resolvable:$false] %s750_s13 }
  0x9f   : > { %s752_s15 = scalar_lea.vmem %s751_s13, 4096  ;;  %p753_p9 = scmp.lt.s32.totalorder %s1175_s29, %s751_s13 }
  0xa0   : > { %p754_p11 = scmp.lt.s32.totalorder %s752_s15, %s748_s12 }
  0xa2   : > { %p755_p12 = por %p754_p11, %p753_p9 }
  0xa4   : > { %p756_p2 = pnand %p755_p12, %p749_p8 }
  0xa6   : > { %759 = shalt.err (!%p756_p2)
}
  0xa7   : > { %s760_s9 = scalar_lea.hbm %s1173_s5, 512  ;;  %s762_s22 = scalar_lea.hbm %s1218_s1, 1024 }
  0xa8   : > { %p761_p3 = scmp.ne.s32.totalorder %s1173_s5, %s760_s9  ;;  %p763_p4 = scmp.lt.u32.totalorder %s1173_s5, %s1218_s1 }
  0xa9   : > { %p764_p5 = scmp.lt.u32.totalorder %s762_s22, %s760_s9  ;;  %p766_p7 = scmp.lt.u32.totalorder %s760_s9, %s1173_s5 }
  0xab   : > { %p765_p6 = por %p764_p5, %p763_p4 }
  0xad   : > { %p767_p10 = por %p766_p7, %p765_p6 }
  0xaf   : > { %p768_p13 = pnand %p767_p10, %p761_p3 }
  0xb1   : > { %771 = shalt.err (!%p768_p13)
}
  0xb2   : > { %s833_s28 = smov 512   ;;  %s834_s30 = smov 1024  }
  0xb3   : > { %s835_s2 = smov 32  }
  0xb4   : > { %485 = dma.vmem_to_hbm [thread:$0]  %s1175_s29, 512, %s1173_s5, %s458_s23, %s833_s28, %s834_s30, %s835_s2  }
  0xb5 PF: > { %s494_s17 = sand.u32 1, %s806_s6   ;;  %p1245_p0 = scmp.ne.s32.totalorder %s1222_s20, 0 }
  0xb6   : > { %p1246_p1 = scmp.ge.s32.totalorder %s826_s11, 2  ;;  %s495_s26 = scalar_lea.sflag [#allocation4], %s494_s17 }
  0xb8   : > { %p602_p8 = pnand %p1246_p1, %p1245_p0 }
  0xba   : > { %801 = dma.done.wait (!%p602_p8), %s495_s26, 2048  }
  0xbb   : > { %803 = vsyncadd (!%p602_p8), %s495_s26, 4294965248  ;;  %s17_s11 = sadd.s32 1, %s826_s11   ;;  %s1247_s6 = smov %s810_s7 }
  0xbc   : > { %p14_p9 = scmp.ge.s32.totalorder %s17_s11, 4   ;;  %s1248_s7 = smov %s814_s8 }
  0xbd   : > { %s1249_s8 = smov %s898_s19  ;;  %s1250_s9 = smov %s822_s10 }
  0xbe   : > { %s1251_s10 = smov %s1253_s14  ;;  %16 = sbr.rel (!%p14_p9) target bundleno = 6 (0x6), region = 69 }
  0xc5   :  { %500 = vsyncpa [#allocation3], 1 }
  0xc6   :  { %502 = vsyncpa [#allocation3 + $0x1], 1 }
  0xc7   :  { %503 = vsyncpa [#allocation4], 1 }
  0xc8   :  { %505 = vsyncpa [#allocation4 + $0x1], 1 }

</bundles_post_ra>
